<compile_context>
chip_gen: v7x
topology: tpu7x:2x2x1
jax: 0.10.0
libtpu: 0.0.40
codegen_flags: <defaults>
</compile_context>

<pallas_src>
import numpy as np
import jax
import jax.numpy as jnp
from jax.experimental import pallas as pl
from jax.experimental.pallas import tpu as pltpu


def _make_kernel(pack: int):
    """Kernel computing sin(x*f + phase) in a packed, lane-dense layout."""

    def kernel(xp_ref, fm_ref, ph_ref, out_ref):
        # xp_ref:  (TR, pack)     packed timesteps: xp[r, j] = x[pack*r + j]
        # fm_ref:  (pack, LANES)  masked freq table: row j is zero outside lane
        #                         group j and holds [freqs | freqs] inside it
        # ph_ref:  (1, LANES)     phase: 0 for sin lanes, pi/2 for cos lanes
        # out_ref: (TR, LANES)    LANES = pack * dim (128 when dim | 128)
        xp = xp_ref[...]
        fm = fm_ref[...]
        # emb[r, c] = x[pack*r + c//dim] * freqs[(c % dim) % half_dim]
        # Built as a sum of (TR,1)x(1,LANES) broadcast-multiplies; the masked
        # freq rows guarantee each lane receives exactly one (exact f32)
        # product, so the sum is exact.  VPU/XLU work only -- the single EUP
        # slot (one sin per output vreg) stays the binding unit.
        emb = xp[:, 0:1] * fm[0:1, :]
        for j in range(1, pack):
            emb = emb + xp[:, j : j + 1] * fm[j : j + 1, :]
        # One EUP sin per element; cos lanes carry a +pi/2 phase.
        out_ref[...] = jnp.sin(emb + ph_ref[...])

    return kernel


def sinusoidal_pos_emb(x, dim, *, tile_rows: int = 2048):
    """x: (B,) positions/timesteps. Returns (B, dim) float32 [sin | cos]."""
    assert dim % 2 == 0 and dim >= 4, "dim must be even and >= 4"
    assert tile_rows % 8 == 0, "tile_rows must be a sublane multiple"
    half_dim = dim // 2

    # Host-computed tables (f32-consistent with the PyTorch module's math).
    scale = np.log(10000.0) / (half_dim - 1)
    freqs = np.exp(np.arange(half_dim, dtype=np.float32) * np.float32(-scale))
    freqs = freqs.astype(np.float32)                              # (half_dim,)
    freq_group = np.concatenate([freqs, freqs])                   # (dim,) sin|cos halves
    phase_group = np.concatenate(
        [np.zeros(half_dim, np.float32),
         np.full(half_dim, np.float32(np.pi / 2), np.float32)])   # (dim,)

    # Pack `pack` consecutive timesteps per output row so the last dim is
    # lane-dense (128 wide when dim divides 128); cap the unrolled broadcast
    # terms at 8.  dim >= 128 (or ragged dim) falls back to pack = 1.
    if dim < 128 and 128 % dim == 0:
        pack = min(128 // dim, 8)
    else:
        pack = 1
    lanes = pack * dim

    freq_masked = np.zeros((pack, lanes), np.float32)
    for j in range(pack):
        freq_masked[j, j * dim:(j + 1) * dim] = freq_group
    phase = np.tile(phase_group, pack).reshape(1, lanes)

    B = x.shape[0]
    rows = pl.cdiv(B, pack)                          # packed rows needed
    if rows <= tile_rows:
        tr, rows_p, grid = rows, rows, 1             # single full-array block
    else:
        tr = tile_rows
        rows_p = pl.cdiv(rows, tr) * tr
        grid = rows_p // tr
    b_pad = rows_p * pack

    xf = x.astype(jnp.float32).reshape(-1)
    if b_pad != B:                                   # only the tiny (B,) vector is padded
        xf = jnp.pad(xf, (0, b_pad - B))
    xp = xf.reshape(rows_p, pack)

    out = pl.pallas_call(
        _make_kernel(pack),
        out_shape=jax.ShapeDtypeStruct((rows_p, lanes), jnp.float32),
        grid=(grid,),
        in_specs=[
            pl.BlockSpec((tr, pack), lambda i: (i, 0)),
            pl.BlockSpec((pack, lanes), lambda i: (0, 0)),   # constant freq table
            pl.BlockSpec((1, lanes), lambda i: (0, 0)),      # constant phase table
        ],
        out_specs=pl.BlockSpec((tr, lanes), lambda i: (i, 0)),
        compiler_params=pltpu.CompilerParams(
            # Splits grid steps across the two TCs on v7x when grid >= 2
            # (large-B path); no-op at the shipped B=8 size and on v5e/v6e.
            dimension_semantics=("parallel",),
            vmem_limit_bytes=32 * 1024 * 1024,   # portable vs v7x's 64 MiB VMEM
        ),
    )(xp, jnp.asarray(freq_masked), jnp.asarray(phase))

    # (rows_p, pack*dim) -> (rows_p*pack, dim) is a free contiguous reshape.
    out = out.reshape(b_pad, dim)
    # Slice only on ragged B (extra copy); aligned B takes the no-copy path.
    return out[:B] if b_pad != B else out


def _reference(x, dim):
    # Float32-consistent reference (matches the module's math in f32 precision).
    half_dim = dim // 2
    scale = np.log(10000.0) / (half_dim - 1)
    freqs = np.exp(
        np.arange(half_dim, dtype=np.float32) * np.float32(-scale)
    ).astype(np.float32)
    emb = np.asarray(x, dtype=np.float32)[:, None] * freqs[None, :]
    return np.concatenate([np.sin(emb), np.cos(emb)], axis=-1).astype(np.float32)


if __name__ == "__main__":
    key = jax.random.PRNGKey(0)

    # Small shape matching diffusion-model usage: B timesteps, dim-wide embedding.
    B, dim = 8, 32
    x = jax.random.uniform(key, (B,), dtype=jnp.float32, minval=0.0, maxval=1000.0)

    out = jax.block_until_ready(sinusoidal_pos_emb(x, dim))
    ref = _reference(np.asarray(x), dim)
    # Tolerance covers f32 sin/cos argument-reduction error for args up to ~1e3 rad.
    np.testing.assert_allclose(np.asarray(out), ref, rtol=1e-3, atol=1e-3)
    assert out.shape == (B, dim)

    # Gridded, fully aligned path (multiple grid steps, no pad / no slice).
    B2 = 8192
    x2 = jax.random.uniform(
        jax.random.PRNGKey(1), (B2,), dtype=jnp.float32, minval=0.0, maxval=1000.0
    )
    out2 = jax.block_until_ready(sinusoidal_pos_emb(x2, dim, tile_rows=256))
    ref2 = _reference(np.asarray(x2), dim)
    np.testing.assert_allclose(np.asarray(out2), ref2, rtol=1e-3, atol=1e-3)
    assert out2.shape == (B2, dim)

    # Ragged-B fallback path (tiny x-pad + one output slice).
    B3 = 1030
    x3 = jax.random.uniform(
        jax.random.PRNGKey(2), (B3,), dtype=jnp.float32, minval=0.0, maxval=1000.0
    )
    out3 = jax.block_until_ready(sinusoidal_pos_emb(x3, dim))
    ref3 = _reference(np.asarray(x3), dim)
    np.testing.assert_allclose(np.asarray(out3), ref3, rtol=1e-3, atol=1e-3)
    assert out3.shape == (B3, dim)

    print("KERNEL_OK")
</pallas_src>

<mosaic_0001>
module attributes {stable_mosaic.version = 11 : i64} {
  func.func @kernel(%arg0: i32, %arg1: memref<2x4xf32, #tpu.memory_space<vmem>>, %arg2: memref<4x128xf32, #tpu.memory_space<vmem>>, %arg3: memref<1x128xf32, #tpu.memory_space<vmem>>, %arg4: memref<2x128xf32, #tpu.memory_space<vmem>>) attributes {dimension_semantics = [#tpu.dimension_semantics<parallel>], iteration_bounds = array<i64: 1>, scalar_prefetch = 0 : i64, scratch_operands = 0 : i64, tpu.core_type = #tpu.core_type<tc>, window_params = [{transform_indices = @transform_0, window_bounds = array<i64: 2, 4>}, {pipeline_mode = #tpu.pipeline_mode<synchronous>, transform_indices = @transform_1, window_bounds = array<i64: 4, 128>}, {pipeline_mode = #tpu.pipeline_mode<synchronous>, transform_indices = @transform_2, window_bounds = array<i64: 1, 128>}, {transform_indices = @transform_3, window_bounds = array<i64: 2, 128>}]} {
    %c0 = arith.constant 0 : index
    %c0_0 = arith.constant 0 : index
    %0 = vector.load %arg1[%c0, %c0_0] : memref<2x4xf32, #tpu.memory_space<vmem>>, vector<2x4xf32>
    %c0_1 = arith.constant 0 : index
    %c0_2 = arith.constant 0 : index
    %1 = vector.load %arg2[%c0_1, %c0_2] : memref<4x128xf32, #tpu.memory_space<vmem>>, vector<4x128xf32>
    %2 = vector.extract_strided_slice %0 {offsets = [0, 0], sizes = [2, 1], strides = [1, 1]} : vector<2x4xf32> to vector<2x1xf32>
    %3 = vector.extract_strided_slice %1 {offsets = [0, 0], sizes = [1, 128], strides = [1, 1]} : vector<4x128xf32> to vector<1x128xf32>
    %4 = vector.broadcast %2 : vector<2x1xf32> to vector<2x128xf32>
    %5 = vector.broadcast %3 : vector<1x128xf32> to vector<2x128xf32>
    %6 = arith.mulf %4, %5 : vector<2x128xf32>
    %7 = vector.extract_strided_slice %0 {offsets = [0, 1], sizes = [2, 1], strides = [1, 1]} : vector<2x4xf32> to vector<2x1xf32>
    %8 = vector.extract_strided_slice %1 {offsets = [1, 0], sizes = [1, 128], strides = [1, 1]} : vector<4x128xf32> to vector<1x128xf32>
    %9 = vector.broadcast %7 : vector<2x1xf32> to vector<2x128xf32>
    %10 = vector.broadcast %8 : vector<1x128xf32> to vector<2x128xf32>
    %11 = arith.mulf %9, %10 : vector<2x128xf32>
    %12 = arith.addf %6, %11 : vector<2x128xf32>
    %13 = vector.extract_strided_slice %0 {offsets = [0, 2], sizes = [2, 1], strides = [1, 1]} : vector<2x4xf32> to vector<2x1xf32>
    %14 = vector.extract_strided_slice %1 {offsets = [2, 0], sizes = [1, 128], strides = [1, 1]} : vector<4x128xf32> to vector<1x128xf32>
    %15 = vector.broadcast %13 : vector<2x1xf32> to vector<2x128xf32>
    %16 = vector.broadcast %14 : vector<1x128xf32> to vector<2x128xf32>
    %17 = arith.mulf %15, %16 : vector<2x128xf32>
    %18 = arith.addf %12, %17 : vector<2x128xf32>
    %19 = vector.extract_strided_slice %0 {offsets = [0, 3], sizes = [2, 1], strides = [1, 1]} : vector<2x4xf32> to vector<2x1xf32>
    %20 = vector.extract_strided_slice %1 {offsets = [3, 0], sizes = [1, 128], strides = [1, 1]} : vector<4x128xf32> to vector<1x128xf32>
    %21 = vector.broadcast %19 : vector<2x1xf32> to vector<2x128xf32>
    %22 = vector.broadcast %20 : vector<1x128xf32> to vector<2x128xf32>
    %23 = arith.mulf %21, %22 : vector<2x128xf32>
    %24 = arith.addf %18, %23 : vector<2x128xf32>
    %c0_3 = arith.constant 0 : index
    %c0_4 = arith.constant 0 : index
    %25 = vector.load %arg3[%c0_3, %c0_4] : memref<1x128xf32, #tpu.memory_space<vmem>>, vector<1x128xf32>
    %26 = vector.broadcast %25 : vector<1x128xf32> to vector<2x128xf32>
    %27 = arith.addf %24, %26 : vector<2x128xf32>
    %28 = math.sin %27 : vector<2x128xf32>
    %c0_5 = arith.constant 0 : index
    %c0_6 = arith.constant 0 : index
    %29 = vector.load %arg4[%c0_5, %c0_6] : memref<2x128xf32, #tpu.memory_space<vmem>>, vector<2x128xf32>
    tpu.vector_store %arg4[%c0_5, %c0_6], %28 {strides = array<i32>} : memref<2x128xf32, #tpu.memory_space<vmem>>, vector<2x128xf32>,
    return
  }
  func.func @transform_0(%arg0: i32) -> (i32, i32) {
    %c0_i32 = arith.constant 0 : i32
    %c0_i32_0 = arith.constant 0 : i32
    return %arg0, %c0_i32 : i32, i32
  }
  func.func @transform_1(%arg0: i32) -> (i32, i32) {
    %c0_i32 = arith.constant 0 : i32
    %c0_i32_0 = arith.constant 0 : i32
    %c0_i32_1 = arith.constant 0 : i32
    return %c0_i32, %c0_i32_0 : i32, i32
  }
  func.func @transform_2(%arg0: i32) -> (i32, i32) {
    %c0_i32 = arith.constant 0 : i32
    %c0_i32_0 = arith.constant 0 : i32
    %c0_i32_1 = arith.constant 0 : i32
    return %c0_i32, %c0_i32_0 : i32, i32
  }
  func.func @transform_3(%arg0: i32) -> (i32, i32) {
    %c0_i32 = arith.constant 0 : i32
    %c0_i32_0 = arith.constant 0 : i32
    return %arg0, %c0_i32 : i32, i32
  }
}

</mosaic_0001>

<bundles_post_ra>
// kernel: tpu_custom_call.1
= control target key start
LH: loop header
LB: loop body
LE: loop exit
PB: predicated region body
PF: predicated region fallthrough
CT: control target
= control target key end

     0   :  { %8 = vsyncpa [#allocation3], 0  ;;  %s406_s0 = inlined_call_operand.hbm [shape: f32[2,4], index: 0, kind: input, shape index: {}]   ;;  %s407_s1 = inlined_call_operand.hbm [shape: f32[4,128], index: 1, kind: input, shape index: {}]   ;;  %s408_s2 = inlined_call_operand.vmem [shape: f32[1,128], index: 2, kind: input, shape index: {}]   ;;  %s409_s3 = inlined_call_operand.hbm [shape: f32[2,128], index: 3, kind: output, shape index: {}]  }
   0x1   :  { %9 = vsyncpa [#allocation6], 0 }
   0x2   :  { %10 = vsyncpa [#allocation4], 0  ;;  %s313_s12 = smov [#allocation2]   ;;  %s314_s14 = smov [#allocation5]  }
   0x3   :  { %s17_s13 = sshll.u32 %s313_s12, 4  ;;  %s27_s15 = sshll.u32 %s314_s14, 4  ;;  %s18_s13 = int_to_ptr.vmem [resolvable:$true] %s17_s13  ;;  %s28_s15 = int_to_ptr.vmem [resolvable:$true] %s27_s15 }
   0x4   :  { %s241_s18 = scalar_lea.hbm %s406_s0, 32 }
   0x5   :  { %p242_p0 = scmp.ne.s32.totalorder %s406_s0, %s241_s18  ;;  %p245_p1 = scmp.lt.u32.totalorder %s241_s18, %s406_s0 }
   0x7   :  { %p247_p2 = pnand %p245_p1, %p242_p0 }
   0x9   :  { %250 = shalt.err (!%p247_p2)
}
   0xa   :  { %s251_s23 = scalar_lea.vmem %s18_s13, 32  ;;  %p256_p4 = scmp.lt.s32.totalorder %s18_s13, %s18_s13 }
   0xb   :  { %p252_p3 = scmp.ne.s32.totalorder %s18_s13, %s251_s23  ;;  %p257_p5 = scmp.lt.s32.totalorder %s251_s23, %s251_s23 }
   0xd   :  { %p258_p6 = por %p257_p5, %p256_p4 }
   0xf   :  { %p259_p7 = pnand %p258_p6, %p252_p3 }
  0x11   :  { %262 = shalt.err (!%p259_p7)
}
  0x12   :  { %20 = dma.hbm_to_vmem [thread:$0]  %s406_s0, 32, %s18_s13, [#allocation3]  }
  0x13   :  { %s263_s28 = scalar_lea.hbm %s407_s1, 64 }
  0x14   :  { %p264_p8 = scmp.ne.s32.totalorder %s407_s1, %s263_s28  ;;  %p267_p9 = scmp.lt.u32.totalorder %s263_s28, %s407_s1 }
  0x16   :  { %p269_p10 = pnand %p267_p9, %p264_p8 }
  0x18   :  { %272 = shalt.err (!%p269_p10)
}
  0x19   :  { %s273_s6 = scalar_lea.vmem %s28_s15, 64  ;;  %p278_p12 = scmp.lt.s32.totalorder %s28_s15, %s28_s15 }
  0x1a   :  { %p274_p11 = scmp.ne.s32.totalorder %s28_s15, %s273_s6  ;;  %p279_p13 = scmp.lt.s32.totalorder %s273_s6, %s273_s6 }
  0x1c   :  { %p280_p0 = por %p279_p13, %p278_p12 }
  0x1e   :  { %p281_p1 = pnand %p280_p0, %p274_p11 }
  0x20   :  { %284 = shalt.err (!%p281_p1)
}
  0x21   :  { %30 = dma.hbm_to_vmem [thread:$0]  %s407_s1, 64, %s28_s15, [#allocation6]  }
  0x22   :  { %307 = dma.done.wait [#allocation3], 32  }
  0x23   :  { %308 = vsyncadd [#allocation3], 4294967264 }
  0x24   :  { %309 = dma.done.wait [#allocation6], 64  }
  0x25   :  { %310 = vsyncadd [#allocation6], 4294967232  ;;  %v315_v0 = vmov 0   ;;  %v316_v1 = vmov 2   ;;  %v39_v2 = vld [vmem:[#allocation2] sm:$0x3]  ;;  %v46_v5 = vlaneseq }
  0x26   :  { %232 = vset.pattern.permute.xlu0 %v315_v0  ;;  %234 = vset.pattern.permute.xlu1 %v316_v1  ;;  %v317_v3 = vmov 1   ;;  %v318_v4 = vmov 3   ;;  %v40_v9 = vld [vmem:[#allocation5] sm:$0xf]  ;;  %v210_v26 = vld [vmem:[%s408_s2] ss:$0 sm:$0xff] }
  0x27   :  { %43 = vperm.xlu0 %232, %v39_v2   ;;  %62 = vperm.xlu1 %234, %v39_v2   ;;  %v47_v6 = vshrl.u32 %v46_v5, 7  ;;  %v319_v39 = vmov 683565275   ;;  %v320_v41 = vmov 2475754826   ;;  %s325_s2 = smov [#allocation7]  }
  0x28   :  { %v321_v44 = vmov 2131351028   ;;  %v322_v47 = vmov 2102212464   ;;  %v323_v50 = vmov 920167782  }
  0x29   :  { %v48_v7 = vsub.s32 0, %v47_v6  ;;  %v57_v8 = vsub.s32 1, %v47_v6  ;;  %v67_v11 = vsub.s32 2, %v47_v6  ;;  %v77_v13 = vsub.s32 3, %v47_v6  ;;  %s200_s9 = sshll.u32 %s325_s2, 4  ;;  %s201_s9 = int_to_ptr.vmem [resolvable:$true] %s200_s9 }
  0x2a   :  { %v324_v53 = vmov 1326507024   ;;  %s285_s10 = scalar_lea.vmem %s201_s9, 32  ;;  %p290_p3 = scmp.lt.s32.totalorder %s201_s9, %s201_s9 }
  0x2b   :  { %233 = vset.pattern.permute.xlu0 %v317_v3  ;;  %235 = vset.pattern.permute.xlu1 %v318_v4  ;;  %v49_v14 = vrot.slane %v40_v9, %v48_v7  ;;  %v58_v15 = vrot.slane %v40_v9, %v57_v8  ;;  %v68_v16 = vrot.slane %v40_v9, %v67_v11  ;;  %p286_p2 = scmp.ne.s32.totalorder %s201_s9, %s285_s10  ;;  %p291_p4 = scmp.lt.s32.totalorder %s285_s10, %s285_s10 }
  0x2c   :  { %52 = vperm.xlu0 %233, %v39_v2   ;;  %72 = vperm.xlu1 %235, %v39_v2   ;;  %v78_v17 = vrot.slane %v40_v9, %v77_v13 }
  0x2d   :  { %p292_p5 = por %p291_p4, %p290_p3 }
  0x2f   :  { %p293_p6 = pnand %p292_p5, %p286_p2 }
  0x30   :  { %236 = vset.pattern.permute.xlu0 %v318_v4 }
  0xa6   :  { %v44_v10 = vpop.permute.xlu0 %43  ;;  %v63_v12 = vpop.permute.xlu1 %62 }
  0xa7   :  { %v50_v20 = vmul.f32 %v49_v14, %v44_v10  ;;  %v69_v22 = vmul.f32 %v68_v16, %v63_v12 }
  0xab   :  { %v53_v18 = vpop.permute.xlu0 %52  ;;  %v73_v19 = vpop.permute.xlu1 %72 }
  0xac   :  { %v59_v21 = vmul.f32 %v58_v15, %v53_v18  ;;  %v79_v24 = vmul.f32 %v78_v17, %v73_v19 }
  0xae   :  { %v60_v23 = vadd.f32 %v59_v21, %v50_v20 }
  0xb0   :  { %v70_v25 = vadd.f32 %v69_v22, %v60_v23 }
  0xb2   :  { %v80_v27 = vadd.f32 %v79_v24, %v70_v25 }
  0xb4   :  { %v373_v28 = vadd.f32 %v210_v26, %v80_v27 }
  0xb6   :  { %v92_v29 = vand.u32 2139095040, %v373_v28  ;;  %v89_v33 = vand.u32 2147483647, %v373_v28  ;;  %vm91_vm7 = vcmp.lt.s32.totalorder %v373_v28, 0  ;;  %vm181_vm12 = vweird.f32 %v373_v28 }
  0xb8   :  { %v93_v30 = vshrl.u32 %v92_v29, 23  ;;  %v96_v37 = vand.u32 8388607, %v89_v33  ;;  %vm90_vm8 = vcmp.le.f32.partialorder %v89_v33, 0.7853982 }
  0xba   :  { %v211_v31 = vadd.s32 4294967169, %v93_v30  ;;  %v97_v55 = vor.u32 8388608, %v96_v37 }
  0xbc   :  { %v99_v32 = vadd.s32 1, %v211_v31  ;;  %v137_v5 = vshll.u32 %v97_v55, 8 }
  0xbe   :  { %vm100_vm0 = vcmp.gt.s32.totalorder %v99_v32, 0 }
  0xbf   :  { %v101_v34 = vsel %vm100_vm0, %v99_v32, 0 }
  0xc0   :  { %v103_v35 = vand.u32 31, %v101_v34  ;;  %v102_v38 = vshrl.u32 %v101_v34, 5 }
  0xc2   :  { %v104_v36 = vsub.s32 32, %v103_v35  ;;  %v106_v40 = vshll.u32 %v319_v39, %v103_v35  ;;  %v109_v42 = vshll.u32 %v320_v41, %v103_v35  ;;  %v112_v46 = vshll.u32 %v321_v44, %v103_v35 }
  0xc3   :  { %v115_v49 = vshll.u32 %v322_v47, %v103_v35  ;;  %v118_v52 = vshll.u32 %v323_v50, %v103_v35  ;;  %vm121_vm1 = vcmp.lt.s32.totalorder %v102_v38, 1  ;;  %vm124_vm2 = vcmp.lt.s32.totalorder %v102_v38, 4 }
  0xc4   :  { %v107_v43 = vshrl.u32 %v320_v41, %v104_v36  ;;  %v110_v45 = vshrl.u32 %v321_v44, %v104_v36  ;;  %v113_v48 = vshrl.u32 %v322_v47, %v104_v36  ;;  %v116_v51 = vshrl.u32 %v323_v50, %v104_v36 }
  0xc5   :  { %v119_v54 = vshrl.u32 %v324_v53, %v104_v36  ;;  %v105_v0 = vshrl.u32 %v319_v39, %v104_v36  ;;  %vm123_vm3 = vcmp.lt.s32.totalorder %v102_v38, 3  ;;  %vm122_vm4 = vcmp.lt.s32.totalorder %v102_v38, 2 }
  0xc6   :  { %v108_v56 = vor.u32 %v107_v43, %v106_v40  ;;  %v111_v57 = vor.u32 %v110_v45, %v109_v42  ;;  %v114_v58 = vor.u32 %v113_v48, %v112_v46  ;;  %v117_v59 = vor.u32 %v116_v51, %v115_v49 }
  0xc7   :  { %v120_v60 = vor.u32 %v119_v54, %v118_v52 }
  0xc8   :  { %v126_v61 = vsel %vm124_vm2, %v114_v58, 2102212464  ;;  %v129_v62 = vsel %vm121_vm1, %v108_v56, %v111_v57  ;;  %v133_v63 = vsel %vm121_vm1, %v111_v57, %v114_v58  ;;  %v130_v1 = vsel %vm124_vm2, %v117_v59, 920167782 }
  0xc9   :  { %v134_v2 = vsel %vm124_vm2, %v120_v60, 1326507024  ;;  %v131_v3 = vsel %vm123_vm3, %v114_v58, %v130_v1  ;;  %v125_v6 = vsel %vm121_vm1, %v105_v0, %v108_v56  ;;  %v127_v7 = vsel %vm123_vm3, %v111_v57, %v126_v61 }
  0xca   :  { %v135_v4 = vsel %vm123_vm3, %v117_v59, %v134_v2  ;;  %v132_v8 = vsel %vm122_vm4, %v129_v62, %v131_v3  ;;  %v128_v14 = vsel %vm122_vm4, %v125_v6, %v127_v7 }
  0xcb   :  { %v136_v9 = vsel %vm122_vm4, %v133_v63, %v135_v4  ;;  %v382_v12 = vmul.u32.u64.low %v137_v5, %v132_v8  ;;  %v383_v13 = vmul.u32.u64.high %v137_v5, %v132_v8, %v382_v12  ;;  %v144_v16 = vmul.u32 %v137_v5, %v128_v14 }
  0xcc   :  { %v379_v10 = vmul.u32.u64.low %v137_v5, %v136_v9  ;;  %v380_v11 = vmul.u32.u64.high %v137_v5, %v136_v9, %v379_v10 }
  0xcd   :  { %v147_v15 = vadd.s32 1, %v383_v13 }
  0xce   :  { %vm146_vm5 = vc.u32 %v380_v11, %v382_v12  ;;  %v145_v29 = vadd.s32 %v382_v12, %v380_v11 }
  0xcf   :  { %v148_v17 = vsel %vm146_vm5, %v147_v15, %v383_v13 }
  0xd0   :  { %v149_v18 = vadd.s32 %v148_v17, %v144_v16 }
  0xd2   :  { %v150_v19 = vadd.s32 536870912, %v149_v18 }
  0xd4   :  { %v151_v20 = vshrl.u32 %v150_v19, 30 }
  0xd6   :  { %v152_v21 = vshll.u32 %v151_v20, 30  ;;  %v175_v42 = vsub.s32 4, %v151_v20 }
  0xd8   :  { %v153_v22 = vsub.s32 %v149_v18, %v152_v21  ;;  %v176_v45 = vsel %vm91_vm7, %v175_v42, %v151_v20 }
  0xd9   :  { %v178_v47 = vsel %vm90_vm8, 0, %v176_v45 }
  0xda   :  { %v155_v23 = vsub.s32 0, %v153_v22  ;;  %v182_v48 = vadd.s32 3, %v178_v47 }
  0xdc   :  { %v212_v24 = vmin.u32 %v155_v23, %v153_v22  ;;  %v183_v49 = vand.u32 3, %v182_v48 }
  0xde   :  { %v157_v25 = vclz %v212_v24  ;;  %vm188_vm9 = vcmp.eq.s32.totalorder %v183_v49, 2  ;;  %vm185_vm10 = vcmp.eq.s32.totalorder %v183_v49, 0  ;;  %vm184_vm11 = vcmp.lt.s32.totalorder %v183_v49, 2 }
  0xe0   :  { %v213_v26 = vadd.s32 4294967294, %v157_v25 }
  0xe2   :  { %vm214_vm6 = vcmp.lt.s32.totalorder %v213_v26, 0 }
  0xe3   :  { %v160_v27 = vsel %vm214_vm6, 0, %v213_v26 }
  0xe4   :  { %v161_v30 = vsub.s32 32, %v160_v27  ;;  %v165_v31 = vsub.s32 4294967266, %v160_v27  ;;  %v162_v32 = vshll.u32 %v153_v22, %v160_v27 }
  0xe6   :  { %v163_v34 = vshrl.u32 %v145_v29, %v161_v30  ;;  %v166_v35 = vadd.s32 127, %v165_v31 }
  0xe8   :  { %v164_v36 = vor.u32 %v163_v34, %v162_v32  ;;  %v167_v37 = vshll.u32 %v166_v35, 23 }
  0xea   :  { %v168_v38 = vor.u32 4788187, %v167_v37  ;;  %v171_v40 = vcvt.s32.f32 %v164_v36 }
  0xec   :  { %v169_v39 = vand.u32 2147483647, %v168_v38 }
  0xee   :  { %v172_v41 = vmul.f32 %v171_v40, %v169_v39 }
  0xf0   :  { %v173_v43 = vxor.u32 2147483648, %v172_v41 }
  0xf2   :  { %v174_v44 = vsel %vm91_vm7, %v173_v43, %v172_v41 }
  0xf3   :  { %v177_v46 = vsel %vm90_vm8, %v373_v28, %v174_v44 }
  0xf4   :  { %237 = vcosq.f32 %v177_v46 }
  0xf5   :  { %239 = vsinq.f32 %v177_v46 }
  0xfe   :  { %v238_v50 = vpop.eup %237 }
  0xff   :  { %v240_v51 = vpop.eup %239  ;;  %v189_v52 = vxor.u32 2147483648, %v238_v50 }
 0x100   :  { %v186_v53 = vxor.u32 2147483648, %v240_v51 }
 0x101   :  { %v190_v54 = vsel %vm188_vm9, %v189_v52, %v240_v51 }
 0x102   :  { %v187_v33 = vsel %vm185_vm10, %v238_v50, %v186_v53 }
 0x103   :  { %v191_v55 = vsel %vm184_vm11, %v187_v33, %v190_v54 }
 0x104   :  { %v192_v56 = vsel %vm181_vm12, nan, %v191_v55 }
 0x105   :  { %193 = vst [vmem:[#allocation7] sm:$0x3] %v192_v56 }
 0x106   :  { %296 = shalt.err (!%p293_p6)
}
 0x107   :  { %s297_s13 = scalar_lea.hbm %s409_s3, 32 }
 0x108   :  { %p298_p7 = scmp.ne.s32.totalorder %s409_s3, %s297_s13  ;;  %p301_p8 = scmp.lt.u32.totalorder %s297_s13, %s409_s3 }
 0x10a   :  { %p303_p9 = pnand %p301_p8, %p298_p7 }
 0x10c   :  { %306 = shalt.err (!%p303_p9)
}
 0x10d   :  { %203 = dma.vmem_to_hbm [thread:$0]  %s201_s9, 32, %s409_s3, [#allocation4]  }
 0x10e   :  { %311 = dma.done.wait [#allocation4], 32  }
 0x10f   :  { %312 = vsyncadd [#allocation4], 4294967264 }
 0x110   :  { %207 = vsyncpa [#allocation3], 1 }
 0x111   :  { %208 = vsyncpa [#allocation6], 1 }
 0x112   :  { %209 = vsyncpa [#allocation4], 1 }

</bundles_post_ra>
